<compile_context>
chip_gen: v5e
topology: v5e:2x2
jax: 0.10.0
libtpu: 0.0.40
codegen_flags: <defaults>
</compile_context>

<pallas_src>
from functools import partial

import numpy as np
import jax
import jax.numpy as jnp
from jax.experimental import pallas as pl
from jax.experimental.pallas import tpu as pltpu

CIN, COUT, KH, KW = 4, 8, 3, 3


def _num_tensorcores() -> int:
    # Only v7x has 2 TensorCores per chip among the target generations.
    try:
        kind = (jax.devices()[0].device_kind or "").lower()
        return 2 if "v7" in kind else 1
    except Exception:
        return 1


def _conv3x3_kernel(x_ref, w_ref, b_ref, m_ref, o_ref, *, BN, H, W):
    # x_ref: VMEM (BN, CIN, H*W)      unpadded, lane-dense input images
    # w_ref: VMEM (KH*KW, COUT, CIN)  per-tap (COUT, CIN) weight slabs (f32)
    # b_ref: VMEM (COUT, 1)           bias column (f32)
    # m_ref: VMEM (KH*KW, CIN, H*W)   per-tap halo masks, pre-expanded over CIN
    # o_ref: VMEM (BN, COUT, H*W)     lane-dense output images
    HW = H * W

    x = x_ref[...].astype(jnp.float32)                       # (BN, CIN, HW)

    # Hoisted, block-invariant bias broadcast (JAX does not CSE broadcast_in_dim).
    acc = jnp.broadcast_to(b_ref[...][None], (BN, COUT, HW))  # (BN, COUT, HW) f32

    for kh in range(KH):
        for kw in range(KW):
            dh, dw = kh - 1, kw - 1
            t = kh * KW + kw
            shift = (-(dh * W + dw)) % HW   # shifted[..., f] = x[..., f + dh*W + dw]

            # One roll + one mask for the WHOLE block per tap (XLU/VPU),
            # reused across all output channels and all images in the block.
            shifted = x if shift == 0 else pltpu.roll(x, shift, axis=2)
            if not (dh == 0 and dw == 0):
                shifted = shifted * m_ref[t][None]            # (CIN, HW) mask, broadcast over BN

            # CIN contraction on the MXU, batched over the block's leading axis.
            w_bt = jnp.broadcast_to(w_ref[t][None], (BN, COUT, CIN))
            acc = acc + jnp.einsum("boc,bcf->bof", w_bt, shifted,
                                   preferred_element_type=jnp.float32)

    o_ref[...] = acc.astype(o_ref.dtype)                      # unmasked, lane-dense store


def placeholder_forward(x, weight, bias, *, bn_max=256):
    """Placeholder.forward == referred_layer(x); referred_layer = Conv2d(4, 8, 3, padding=1)."""
    N, C, H, W = x.shape
    assert C == CIN and weight.shape == (COUT, CIN, KH, KW) and bias.shape == (COUT,)
    HW = H * W

    # Lane-dense view (free reshape: contiguous in HBM).
    x2 = jnp.reshape(x, (N, CIN, HW))

    # Per-tap (COUT, CIN) weight slabs and bias column, f32 for accumulation.
    w_taps = jnp.transpose(weight, (2, 3, 0, 1)).reshape(KH * KW, COUT, CIN).astype(jnp.float32)
    b_col = bias.reshape(COUT, 1).astype(jnp.float32)

    # Tiny host-side constant: per-tap halo masks over the flattened spatial
    # axis, pre-expanded over CIN so the kernel does no runtime sublane splats.
    hh, ww = np.meshgrid(np.arange(H), np.arange(W), indexing="ij")
    masks = []
    for kh in range(KH):
        for kw in range(KW):
            dh, dw = kh - 1, kw - 1
            valid = (hh + dh >= 0) & (hh + dh < H) & (ww + dw >= 0) & (ww + dw < W)
            masks.append(np.broadcast_to(valid.reshape(1, HW), (CIN, HW)))
    tap_masks = jnp.asarray(np.stack(masks, axis=0), dtype=jnp.float32)   # (9, CIN, HW)

    # Batch blocking: target ~2 MiB of input+output per grid step to amortize
    # per-step overhead; shrink only when the chip has 2 TCs (v7x) so the
    # "parallel" grid axis can actually shard across cores.
    per_image_bytes = (CIN + COUT) * HW * x.dtype.itemsize
    target_bytes = 2 << 20
    bn = int(max(1, min(bn_max, target_bytes // max(1, per_image_bytes), N)))
    ncores = _num_tensorcores()
    if ncores > 1 and N > 1:
        bn = min(bn, max(1, pl.cdiv(N, ncores)))

    # Ragged batch: pad N up to a multiple of bn (no divisor-collapse search).
    n_blocks = pl.cdiv(N, bn)
    Np = n_blocks * bn
    if Np != N:
        x2 = jnp.pad(x2, ((0, Np - N), (0, 0), (0, 0)))
    grid = (n_blocks,)

    flops = 2 * N * COUT * CIN * KH * KW * HW
    bytes_accessed = (Np * CIN * HW * x.dtype.itemsize
                      + Np * COUT * HW * x.dtype.itemsize
                      + w_taps.size * 4 + b_col.size * 4 + tap_masks.size * 4)

    kernel = partial(_conv3x3_kernel, BN=bn, H=H, W=W)
    out = pl.pallas_call(
        kernel,
        out_shape=jax.ShapeDtypeStruct((Np, COUT, HW), x.dtype),
        grid=grid,
        in_specs=[
            pl.BlockSpec((bn, CIN, HW), lambda i: (i, 0, 0)),
            pl.BlockSpec((KH * KW, COUT, CIN), lambda i: (0, 0, 0)),
            pl.BlockSpec((COUT, 1), lambda i: (0, 0)),
            pl.BlockSpec((KH * KW, CIN, HW), lambda i: (0, 0, 0)),
        ],
        out_specs=pl.BlockSpec((bn, COUT, HW), lambda i: (i, 0, 0)),
        compiler_params=pltpu.CompilerParams(dimension_semantics=("parallel",)),
        cost_estimate=pl.CostEstimate(flops=flops, transcendentals=0,
                                      bytes_accessed=bytes_accessed),
    )(x2, w_taps, b_col, tap_masks)

    return jnp.reshape(out[:N], (N, COUT, H, W))


# TODO(synk): ONNX/RELAX export branches (ONNXKernelMark graph op, torch.compile
# kernel reload, build_mapping_mode bookkeeping) are graph-export / tracing
# machinery with no Pallas equivalent; only the default numeric forward path is
# implemented.


if __name__ == "__main__":
    key = jax.random.PRNGKey(0)
    kx, kw_, kb = jax.random.split(key, 3)

    # Small shapes consistent with the module's forward: NCHW conv input.
    N, C, H, W = 2, 4, 16, 16
    x = jax.random.normal(kx, (N, C, H, W), dtype=jnp.float32)

    # Deterministic parameter init for the referred Conv2d(4, 8, 3, padding=1).
    fan_in = CIN * KH * KW
    weight = jax.random.normal(kw_, (COUT, CIN, KH, KW), dtype=jnp.float32) / jnp.sqrt(fan_in)
    bias = jax.random.normal(kb, (COUT,), dtype=jnp.float32) * 0.1

    out = placeholder_forward(x, weight, bias)
    out = jax.block_until_ready(out)

    # Pure-JAX reference for correctness.
    ref = jax.lax.conv_general_dilated(
        x, weight, window_strides=(1, 1), padding=((1, 1), (1, 1)),
        dimension_numbers=("NCHW", "OIHW", "NCHW"),
    ) + bias[None, :, None, None]

    assert out.shape == (N, COUT, H, W)
    assert out.dtype == x.dtype
    assert jnp.allclose(out, ref, atol=1e-4, rtol=1e-4), "mismatch vs reference conv"
    print("KERNEL_OK")
</pallas_src>

<mosaic_0001>
module attributes {stable_mosaic.version = 11 : i64} {
  func.func @_conv3x3_kernel(%arg0: i32, %arg1: memref<2x4x256xf32, #tpu.memory_space<vmem>>, %arg2: memref<9x8x4xf32, #tpu.memory_space<vmem>>, %arg3: memref<8x1xf32, #tpu.memory_space<vmem>>, %arg4: memref<9x4x256xf32, #tpu.memory_space<vmem>>, %arg5: memref<2x8x256xf32, #tpu.memory_space<vmem>>) attributes {dimension_semantics = [#tpu.dimension_semantics<parallel>], iteration_bounds = array<i64: 1>, scalar_prefetch = 0 : i64, scratch_operands = 0 : i64, tpu.core_type = #tpu.core_type<tc>, window_params = [{transform_indices = @transform_0, window_bounds = array<i64: 2, 4, 256>}, {pipeline_mode = #tpu.pipeline_mode<synchronous>, transform_indices = @transform_1, window_bounds = array<i64: 9, 8, 4>}, {pipeline_mode = #tpu.pipeline_mode<synchronous>, transform_indices = @transform_2, window_bounds = array<i64: 8, 1>}, {pipeline_mode = #tpu.pipeline_mode<synchronous>, transform_indices = @transform_3, window_bounds = array<i64: 9, 4, 256>}, {transform_indices = @transform_4, window_bounds = array<i64: 2, 8, 256>}]} {
    %c0 = arith.constant 0 : index
    %c0_0 = arith.constant 0 : index
    %c0_1 = arith.constant 0 : index
    %0 = vector.load %arg1[%c0, %c0_0, %c0_1] : memref<2x4x256xf32, #tpu.memory_space<vmem>>, vector<2x4x256xf32>
    %c0_2 = arith.constant 0 : index
    %c0_3 = arith.constant 0 : index
    %1 = vector.load %arg3[%c0_2, %c0_3] : memref<8x1xf32, #tpu.memory_space<vmem>>, vector<8x1xf32>
    %2 = vector.shape_cast %1 : vector<8x1xf32> to vector<1x8x1xf32>
    %3 = vector.shape_cast %2 : vector<1x8x1xf32> to vector<1x8x1xf32>
    %4 = vector.broadcast %3 : vector<1x8x1xf32> to vector<2x8x256xf32>
    %c17_i32 = arith.constant 17 : i32
    %5 = tpu.dynamic_rotate %0 by %c17_i32 dim 2 : vector<2x4x256xf32>, i32 -> vector<2x4x256xf32>
    %c0_4 = arith.constant 0 : index
    %c0_5 = arith.constant 0 : index
    %c0_6 = arith.constant 0 : index
    %6 = vector.load %arg4[%c0_4, %c0_5, %c0_6] : memref<9x4x256xf32, #tpu.memory_space<vmem>>, vector<1x4x256xf32>
    %7 = vector.shape_cast %6 : vector<1x4x256xf32> to vector<4x256xf32>
    %8 = vector.shape_cast %7 : vector<4x256xf32> to vector<1x4x256xf32>
    %9 = vector.broadcast %8 : vector<1x4x256xf32> to vector<2x4x256xf32>
    %10 = arith.mulf %5, %9 : vector<2x4x256xf32>
    %c0_7 = arith.constant 0 : index
    %c0_8 = arith.constant 0 : index
    %c0_9 = arith.constant 0 : index
    %11 = vector.load %arg2[%c0_7, %c0_8, %c0_9] : memref<9x8x4xf32, #tpu.memory_space<vmem>>, vector<1x8x4xf32>
    %12 = vector.shape_cast %11 : vector<1x8x4xf32> to vector<8x4xf32>
    %13 = vector.shape_cast %12 : vector<8x4xf32> to vector<1x8x4xf32>
    %14 = vector.shape_cast %13 : vector<1x8x4xf32> to vector<1x8x4xf32>
    %15 = vector.broadcast %14 : vector<1x8x4xf32> to vector<2x8x4xf32>
    "tpu.trace_start"() <{level = 10 : i32, message = "boc,bcf->bof"}> : () -> ()
    %cst = arith.constant dense<0.000000e+00> : vector<2x8x256xf32>
    %16 = tpu.matmul %15, %10, %cst {dimension_numbers = #tpu.dot_dimension_numbers<[2], [1], [1], [2], [0, 0, 0, 1, 1, 2], [0], [0]>} : vector<2x8x4xf32>, vector<2x4x256xf32>, vector<2x8x256xf32> -> vector<2x8x256xf32>
    "tpu.trace_stop"() : () -> ()
    %17 = arith.addf %4, %16 : vector<2x8x256xf32>
    %c16_i32 = arith.constant 16 : i32
    %18 = tpu.dynamic_rotate %0 by %c16_i32 dim 2 : vector<2x4x256xf32>, i32 -> vector<2x4x256xf32>
    %c1 = arith.constant 1 : index
    %c0_10 = arith.constant 0 : index
    %c0_11 = arith.constant 0 : index
    %19 = vector.load %arg4[%c1, %c0_10, %c0_11] : memref<9x4x256xf32, #tpu.memory_space<vmem>>, vector<1x4x256xf32>
    %20 = vector.shape_cast %19 : vector<1x4x256xf32> to vector<4x256xf32>
    %21 = vector.shape_cast %20 : vector<4x256xf32> to vector<1x4x256xf32>
    %22 = vector.broadcast %21 : vector<1x4x256xf32> to vector<2x4x256xf32>
    %23 = arith.mulf %18, %22 : vector<2x4x256xf32>
    %c1_12 = arith.constant 1 : index
    %c0_13 = arith.constant 0 : index
    %c0_14 = arith.constant 0 : index
    %24 = vector.load %arg2[%c1_12, %c0_13, %c0_14] : memref<9x8x4xf32, #tpu.memory_space<vmem>>, vector<1x8x4xf32>
    %25 = vector.shape_cast %24 : vector<1x8x4xf32> to vector<8x4xf32>
    %26 = vector.shape_cast %25 : vector<8x4xf32> to vector<1x8x4xf32>
    %27 = vector.shape_cast %26 : vector<1x8x4xf32> to vector<1x8x4xf32>
    %28 = vector.broadcast %27 : vector<1x8x4xf32> to vector<2x8x4xf32>
    "tpu.trace_start"() <{level = 10 : i32, message = "boc,bcf->bof"}> : () -> ()
    %cst_15 = arith.constant dense<0.000000e+00> : vector<2x8x256xf32>
    %29 = tpu.matmul %28, %23, %cst_15 {dimension_numbers = #tpu.dot_dimension_numbers<[2], [1], [1], [2], [0, 0, 0, 1, 1, 2], [0], [0]>} : vector<2x8x4xf32>, vector<2x4x256xf32>, vector<2x8x256xf32> -> vector<2x8x256xf32>
    "tpu.trace_stop"() : () -> ()
    %30 = arith.addf %17, %29 : vector<2x8x256xf32>
    %c15_i32 = arith.constant 15 : i32
    %31 = tpu.dynamic_rotate %0 by %c15_i32 dim 2 : vector<2x4x256xf32>, i32 -> vector<2x4x256xf32>
    %c2 = arith.constant 2 : index
    %c0_16 = arith.constant 0 : index
    %c0_17 = arith.constant 0 : index
    %32 = vector.load %arg4[%c2, %c0_16, %c0_17] : memref<9x4x256xf32, #tpu.memory_space<vmem>>, vector<1x4x256xf32>
    %33 = vector.shape_cast %32 : vector<1x4x256xf32> to vector<4x256xf32>
    %34 = vector.shape_cast %33 : vector<4x256xf32> to vector<1x4x256xf32>
    %35 = vector.broadcast %34 : vector<1x4x256xf32> to vector<2x4x256xf32>
    %36 = arith.mulf %31, %35 : vector<2x4x256xf32>
    %c2_18 = arith.constant 2 : index
    %c0_19 = arith.constant 0 : index
    %c0_20 = arith.constant 0 : index
    %37 = vector.load %arg2[%c2_18, %c0_19, %c0_20] : memref<9x8x4xf32, #tpu.memory_space<vmem>>, vector<1x8x4xf32>
    %38 = vector.shape_cast %37 : vector<1x8x4xf32> to vector<8x4xf32>
    %39 = vector.shape_cast %38 : vector<8x4xf32> to vector<1x8x4xf32>
    %40 = vector.shape_cast %39 : vector<1x8x4xf32> to vector<1x8x4xf32>
    %41 = vector.broadcast %40 : vector<1x8x4xf32> to vector<2x8x4xf32>
    "tpu.trace_start"() <{level = 10 : i32, message = "boc,bcf->bof"}> : () -> ()
    %cst_21 = arith.constant dense<0.000000e+00> : vector<2x8x256xf32>
    %42 = tpu.matmul %41, %36, %cst_21 {dimension_numbers = #tpu.dot_dimension_numbers<[2], [1], [1], [2], [0, 0, 0, 1, 1, 2], [0], [0]>} : vector<2x8x4xf32>, vector<2x4x256xf32>, vector<2x8x256xf32> -> vector<2x8x256xf32>
    "tpu.trace_stop"() : () -> ()
    %43 = arith.addf %30, %42 : vector<2x8x256xf32>
    %c1_i32 = arith.constant 1 : i32
    %44 = tpu.dynamic_rotate %0 by %c1_i32 dim 2 : vector<2x4x256xf32>, i32 -> vector<2x4x256xf32>
    %c3 = arith.constant 3 : index
    %c0_22 = arith.constant 0 : index
    %c0_23 = arith.constant 0 : index
    %45 = vector.load %arg4[%c3, %c0_22, %c0_23] : memref<9x4x256xf32, #tpu.memory_space<vmem>>, vector<1x4x256xf32>
    %46 = vector.shape_cast %45 : vector<1x4x256xf32> to vector<4x256xf32>
    %47 = vector.shape_cast %46 : vector<4x256xf32> to vector<1x4x256xf32>
    %48 = vector.broadcast %47 : vector<1x4x256xf32> to vector<2x4x256xf32>
    %49 = arith.mulf %44, %48 : vector<2x4x256xf32>
    %c3_24 = arith.constant 3 : index
    %c0_25 = arith.constant 0 : index
    %c0_26 = arith.constant 0 : index
    %50 = vector.load %arg2[%c3_24, %c0_25, %c0_26] : memref<9x8x4xf32, #tpu.memory_space<vmem>>, vector<1x8x4xf32>
    %51 = vector.shape_cast %50 : vector<1x8x4xf32> to vector<8x4xf32>
    %52 = vector.shape_cast %51 : vector<8x4xf32> to vector<1x8x4xf32>
    %53 = vector.shape_cast %52 : vector<1x8x4xf32> to vector<1x8x4xf32>
    %54 = vector.broadcast %53 : vector<1x8x4xf32> to vector<2x8x4xf32>
    "tpu.trace_start"() <{level = 10 : i32, message = "boc,bcf->bof"}> : () -> ()
    %cst_27 = arith.constant dense<0.000000e+00> : vector<2x8x256xf32>
    %55 = tpu.matmul %54, %49, %cst_27 {dimension_numbers = #tpu.dot_dimension_numbers<[2], [1], [1], [2], [0, 0, 0, 1, 1, 2], [0], [0]>} : vector<2x8x4xf32>, vector<2x4x256xf32>, vector<2x8x256xf32> -> vector<2x8x256xf32>
    "tpu.trace_stop"() : () -> ()
    %56 = arith.addf %43, %55 : vector<2x8x256xf32>
    %c4 = arith.constant 4 : index
    %c0_28 = arith.constant 0 : index
    %c0_29 = arith.constant 0 : index
    %57 = vector.load %arg2[%c4, %c0_28, %c0_29] : memref<9x8x4xf32, #tpu.memory_space<vmem>>, vector<1x8x4xf32>
    %58 = vector.shape_cast %57 : vector<1x8x4xf32> to vector<8x4xf32>
    %59 = vector.shape_cast %58 : vector<8x4xf32> to vector<1x8x4xf32>
    %60 = vector.shape_cast %59 : vector<1x8x4xf32> to vector<1x8x4xf32>
    %61 = vector.broadcast %60 : vector<1x8x4xf32> to vector<2x8x4xf32>
    "tpu.trace_start"() <{level = 10 : i32, message = "boc,bcf->bof"}> : () -> ()
    %cst_30 = arith.constant dense<0.000000e+00> : vector<2x8x256xf32>
    %62 = tpu.matmul %61, %0, %cst_30 {dimension_numbers = #tpu.dot_dimension_numbers<[2], [1], [1], [2], [0, 0, 0, 1, 1, 2], [0], [0]>} : vector<2x8x4xf32>, vector<2x4x256xf32>, vector<2x8x256xf32> -> vector<2x8x256xf32>
    "tpu.trace_stop"() : () -> ()
    %63 = arith.addf %56, %62 : vector<2x8x256xf32>
    %c255_i32 = arith.constant 255 : i32
    %64 = tpu.dynamic_rotate %0 by %c255_i32 dim 2 : vector<2x4x256xf32>, i32 -> vector<2x4x256xf32>
    %c5 = arith.constant 5 : index
    %c0_31 = arith.constant 0 : index
    %c0_32 = arith.constant 0 : index
    %65 = vector.load %arg4[%c5, %c0_31, %c0_32] : memref<9x4x256xf32, #tpu.memory_space<vmem>>, vector<1x4x256xf32>
    %66 = vector.shape_cast %65 : vector<1x4x256xf32> to vector<4x256xf32>
    %67 = vector.shape_cast %66 : vector<4x256xf32> to vector<1x4x256xf32>
    %68 = vector.broadcast %67 : vector<1x4x256xf32> to vector<2x4x256xf32>
    %69 = arith.mulf %64, %68 : vector<2x4x256xf32>
    %c5_33 = arith.constant 5 : index
    %c0_34 = arith.constant 0 : index
    %c0_35 = arith.constant 0 : index
    %70 = vector.load %arg2[%c5_33, %c0_34, %c0_35] : memref<9x8x4xf32, #tpu.memory_space<vmem>>, vector<1x8x4xf32>
    %71 = vector.shape_cast %70 : vector<1x8x4xf32> to vector<8x4xf32>
    %72 = vector.shape_cast %71 : vector<8x4xf32> to vector<1x8x4xf32>
    %73 = vector.shape_cast %72 : vector<1x8x4xf32> to vector<1x8x4xf32>
    %74 = vector.broadcast %73 : vector<1x8x4xf32> to vector<2x8x4xf32>
    "tpu.trace_start"() <{level = 10 : i32, message = "boc,bcf->bof"}> : () -> ()
    %cst_36 = arith.constant dense<0.000000e+00> : vector<2x8x256xf32>
    %75 = tpu.matmul %74, %69, %cst_36 {dimension_numbers = #tpu.dot_dimension_numbers<[2], [1], [1], [2], [0, 0, 0, 1, 1, 2], [0], [0]>} : vector<2x8x4xf32>, vector<2x4x256xf32>, vector<2x8x256xf32> -> vector<2x8x256xf32>
    "tpu.trace_stop"() : () -> ()
    %76 = arith.addf %63, %75 : vector<2x8x256xf32>
    %c241_i32 = arith.constant 241 : i32
    %77 = tpu.dynamic_rotate %0 by %c241_i32 dim 2 : vector<2x4x256xf32>, i32 -> vector<2x4x256xf32>
    %c6 = arith.constant 6 : index
    %c0_37 = arith.constant 0 : index
    %c0_38 = arith.constant 0 : index
    %78 = vector.load %arg4[%c6, %c0_37, %c0_38] : memref<9x4x256xf32, #tpu.memory_space<vmem>>, vector<1x4x256xf32>
    %79 = vector.shape_cast %78 : vector<1x4x256xf32> to vector<4x256xf32>
    %80 = vector.shape_cast %79 : vector<4x256xf32> to vector<1x4x256xf32>
    %81 = vector.broadcast %80 : vector<1x4x256xf32> to vector<2x4x256xf32>
    %82 = arith.mulf %77, %81 : vector<2x4x256xf32>
    %c6_39 = arith.constant 6 : index
    %c0_40 = arith.constant 0 : index
    %c0_41 = arith.constant 0 : index
    %83 = vector.load %arg2[%c6_39, %c0_40, %c0_41] : memref<9x8x4xf32, #tpu.memory_space<vmem>>, vector<1x8x4xf32>
    %84 = vector.shape_cast %83 : vector<1x8x4xf32> to vector<8x4xf32>
    %85 = vector.shape_cast %84 : vector<8x4xf32> to vector<1x8x4xf32>
    %86 = vector.shape_cast %85 : vector<1x8x4xf32> to vector<1x8x4xf32>
    %87 = vector.broadcast %86 : vector<1x8x4xf32> to vector<2x8x4xf32>
    "tpu.trace_start"() <{level = 10 : i32, message = "boc,bcf->bof"}> : () -> ()
    %cst_42 = arith.constant dense<0.000000e+00> : vector<2x8x256xf32>
    %88 = tpu.matmul %87, %82, %cst_42 {dimension_numbers = #tpu.dot_dimension_numbers<[2], [1], [1], [2], [0, 0, 0, 1, 1, 2], [0], [0]>} : vector<2x8x4xf32>, vector<2x4x256xf32>, vector<2x8x256xf32> -> vector<2x8x256xf32>
    "tpu.trace_stop"() : () -> ()
    %89 = arith.addf %76, %88 : vector<2x8x256xf32>
    %c240_i32 = arith.constant 240 : i32
    %90 = tpu.dynamic_rotate %0 by %c240_i32 dim 2 : vector<2x4x256xf32>, i32 -> vector<2x4x256xf32>
    %c7 = arith.constant 7 : index
    %c0_43 = arith.constant 0 : index
    %c0_44 = arith.constant 0 : index
    %91 = vector.load %arg4[%c7, %c0_43, %c0_44] : memref<9x4x256xf32, #tpu.memory_space<vmem>>, vector<1x4x256xf32>
    %92 = vector.shape_cast %91 : vector<1x4x256xf32> to vector<4x256xf32>
    %93 = vector.shape_cast %92 : vector<4x256xf32> to vector<1x4x256xf32>
    %94 = vector.broadcast %93 : vector<1x4x256xf32> to vector<2x4x256xf32>
    %95 = arith.mulf %90, %94 : vector<2x4x256xf32>
    %c7_45 = arith.constant 7 : index
    %c0_46 = arith.constant 0 : index
    %c0_47 = arith.constant 0 : index
    %96 = vector.load %arg2[%c7_45, %c0_46, %c0_47] : memref<9x8x4xf32, #tpu.memory_space<vmem>>, vector<1x8x4xf32>
    %97 = vector.shape_cast %96 : vector<1x8x4xf32> to vector<8x4xf32>
    %98 = vector.shape_cast %97 : vector<8x4xf32> to vector<1x8x4xf32>
    %99 = vector.shape_cast %98 : vector<1x8x4xf32> to vector<1x8x4xf32>
    %100 = vector.broadcast %99 : vector<1x8x4xf32> to vector<2x8x4xf32>
    "tpu.trace_start"() <{level = 10 : i32, message = "boc,bcf->bof"}> : () -> ()
    %cst_48 = arith.constant dense<0.000000e+00> : vector<2x8x256xf32>
    %101 = tpu.matmul %100, %95, %cst_48 {dimension_numbers = #tpu.dot_dimension_numbers<[2], [1], [1], [2], [0, 0, 0, 1, 1, 2], [0], [0]>} : vector<2x8x4xf32>, vector<2x4x256xf32>, vector<2x8x256xf32> -> vector<2x8x256xf32>
    "tpu.trace_stop"() : () -> ()
    %102 = arith.addf %89, %101 : vector<2x8x256xf32>
    %c239_i32 = arith.constant 239 : i32
    %103 = tpu.dynamic_rotate %0 by %c239_i32 dim 2 : vector<2x4x256xf32>, i32 -> vector<2x4x256xf32>
    %c8 = arith.constant 8 : index
    %c0_49 = arith.constant 0 : index
    %c0_50 = arith.constant 0 : index
    %104 = vector.load %arg4[%c8, %c0_49, %c0_50] : memref<9x4x256xf32, #tpu.memory_space<vmem>>, vector<1x4x256xf32>
    %105 = vector.shape_cast %104 : vector<1x4x256xf32> to vector<4x256xf32>
    %106 = vector.shape_cast %105 : vector<4x256xf32> to vector<1x4x256xf32>
    %107 = vector.broadcast %106 : vector<1x4x256xf32> to vector<2x4x256xf32>
    %108 = arith.mulf %103, %107 : vector<2x4x256xf32>
    %c8_51 = arith.constant 8 : index
    %c0_52 = arith.constant 0 : index
    %c0_53 = arith.constant 0 : index
    %109 = vector.load %arg2[%c8_51, %c0_52, %c0_53] : memref<9x8x4xf32, #tpu.memory_space<vmem>>, vector<1x8x4xf32>
    %110 = vector.shape_cast %109 : vector<1x8x4xf32> to vector<8x4xf32>
    %111 = vector.shape_cast %110 : vector<8x4xf32> to vector<1x8x4xf32>
    %112 = vector.shape_cast %111 : vector<1x8x4xf32> to vector<1x8x4xf32>
    %113 = vector.broadcast %112 : vector<1x8x4xf32> to vector<2x8x4xf32>
    "tpu.trace_start"() <{level = 10 : i32, message = "boc,bcf->bof"}> : () -> ()
    %cst_54 = arith.constant dense<0.000000e+00> : vector<2x8x256xf32>
    %114 = tpu.matmul %113, %108, %cst_54 {dimension_numbers = #tpu.dot_dimension_numbers<[2], [1], [1], [2], [0, 0, 0, 1, 1, 2], [0], [0]>} : vector<2x8x4xf32>, vector<2x4x256xf32>, vector<2x8x256xf32> -> vector<2x8x256xf32>
    "tpu.trace_stop"() : () -> ()
    %115 = arith.addf %102, %114 : vector<2x8x256xf32>
    %c0_55 = arith.constant 0 : index
    %c0_56 = arith.constant 0 : index
    %c0_57 = arith.constant 0 : index
    %116 = vector.load %arg5[%c0_55, %c0_56, %c0_57] : memref<2x8x256xf32, #tpu.memory_space<vmem>>, vector<2x8x256xf32>
    tpu.vector_store %arg5[%c0_55, %c0_56, %c0_57], %115 {strides = array<i32>} : memref<2x8x256xf32, #tpu.memory_space<vmem>>, vector<2x8x256xf32>,
    return
  }
  func.func @transform_0(%arg0: i32) -> (i32, i32, i32) {
    %c0_i32 = arith.constant 0 : i32
    %c0_i32_0 = arith.constant 0 : i32
    %c0_i32_1 = arith.constant 0 : i32
    return %arg0, %c0_i32, %c0_i32_0 : i32, i32, i32
  }
  func.func @transform_1(%arg0: i32) -> (i32, i32, i32) {
    %c0_i32 = arith.constant 0 : i32
    %c0_i32_0 = arith.constant 0 : i32
    %c0_i32_1 = arith.constant 0 : i32
    %c0_i32_2 = arith.constant 0 : i32
    return %c0_i32, %c0_i32_0, %c0_i32_1 : i32, i32, i32
  }
  func.func @transform_2(%arg0: i32) -> (i32, i32) {
    %c0_i32 = arith.constant 0 : i32
    %c0_i32_0 = arith.constant 0 : i32
    %c0_i32_1 = arith.constant 0 : i32
    return %c0_i32, %c0_i32_0 : i32, i32
  }
  func.func @transform_3(%arg0: i32) -> (i32, i32, i32) {
    %c0_i32 = arith.constant 0 : i32
    %c0_i32_0 = arith.constant 0 : i32
    %c0_i32_1 = arith.constant 0 : i32
    %c0_i32_2 = arith.constant 0 : i32
    return %c0_i32, %c0_i32_0, %c0_i32_1 : i32, i32, i32
  }
  func.func @transform_4(%arg0: i32) -> (i32, i32, i32) {
    %c0_i32 = arith.constant 0 : i32
    %c0_i32_0 = arith.constant 0 : i32
    %c0_i32_1 = arith.constant 0 : i32
    return %arg0, %c0_i32, %c0_i32_0 : i32, i32, i32
  }
}

</mosaic_0001>

<bundles_post_ra>
// kernel: tpu_custom_call.1
= control target key start
LH: loop header
LB: loop body
LE: loop exit
PB: predicated region body
PF: predicated region fallthrough
CT: control target
= control target key end

     0   :  { %s1781_s0 = inlined_call_operand.vmem [shape: f32[2,4,256], index: 0, kind: input, shape index: {}]   ;;  %s1782_s1 = inlined_call_operand.vmem [shape: f32[9,8,4], index: 1, kind: input, shape index: {}]   ;;  %s1783_s2 = inlined_call_operand.vmem [shape: f32[8,1], index: 2, kind: input, shape index: {}]   ;;  %s1784_s3 = inlined_call_operand.vmem [shape: f32[9,4,256], index: 3, kind: input, shape index: {}]   ;;  %s1785_s4 = inlined_call_operand.hbm [shape: f32[2,8,256], index: 4, kind: output, shape index: {}]  }
   0x1   :  { %v1464_v0 = vld [vmem:[%s1781_s0 + $0x8] sm:$0xff]  ;;  %v1469_v1 = vld [vmem:[%s1781_s0] sm:$0xff] }
   0x2   :  { %32 = vst [vmem:[#allocation1 + $0x10] ss:$2 sm:$0xff] %v1464_v0 }
   0x3   :  { %28 = vst [vmem:[#allocation1] ss:$2 sm:$0xff] %v1469_v1 }
   0x4   :  { %9 = vsyncpa [#allocation3], 0  ;;  %v54_v2 = vld [vmem:[%s1784_s3] sm:$0xff]  ;;  %s1425_s21 = smov 17   ;;  %v1307_v11 = vld [vmem:[%s1784_s3 + $0x8] sm:$0xff]  ;;  %s1426_s23 = smov 16  }
   0x5   :  { %v1317_v20 = vld [vmem:[%s1784_s3 + $0x10] sm:$0xff]  ;;  %s1427_s26 = smov 15   ;;  %v1327_v29 = vld [vmem:[%s1784_s3 + $0x18] sm:$0xff]  ;;  %s1428_s29 = smov 1   ;;  %v1346_v38 = vld [vmem:[%s1784_s3 + $0x28] sm:$0xff]  ;;  %vm76_vm2 = vcmask 1043456  }
   0x6   :  { %s1429_s6 = smov 127   ;;  %v1356_v47 = vld [vmem:[%s1784_s3 + $0x30] sm:$0xff]  ;;  %s1430_s9 = smov 113   ;;  %v1366_v56 = vld [vmem:[%s1784_s3 + $0x38] sm:$0xff]  ;;  %vm72_vm3 = vcmask 31744  }
   0x7   :  { %s1431_s12 = smov 112   ;;  %s1432_s13 = smov 111  }
   0x8   :  { %s1434_s10 = smov [#allocation2]  }
   0x9   :  { %v33_v3 = vld.sshfl [vmem:[#allocation1 + $0x10] sm:$0xff pattern:$0x75316420]  ;;  %v34_v4 = vld.sshfl [vmem:[#allocation1 + $0x18] sm:$0xff pattern:$0x75316420] }
   0xa   :  { %41 = vrot.lane.b32.xlu0 %v33_v3, %s1425_s21  ;;  %v29_v5 = vld.sshfl [vmem:[#allocation1] sm:$0xff pattern:$0x75316420]  ;;  %v30_v6 = vld.sshfl [vmem:[#allocation1 + $0x8] sm:$0xff pattern:$0x75316420] }
   0xb   :  { %39 = vrot.lane.b32.xlu1 %v29_v5, %s1425_s21  ;;  %56 = vst [vmem:[#allocation1] ss:$2 sm:$0xff] %v54_v2  ;;  %s1285_s11 = sshll.u32 %s1434_s10, 4  ;;  %s1286_s11 = int_to_ptr.vmem [resolvable:$true] %s1285_s11 }
   0xc   :  { %60 = vst [vmem:[#allocation1 + $0x10] ss:$2 sm:$0xff] %v54_v2 }
  0x12   :  { %45 = vrot.lane.b32.xlu0 %v34_v4, %s1425_s21  ;;  %v1476_v7 = vld.sshfl [vmem:[#allocation1] sm:$0xff pattern:$0x75316420]  ;;  %v1478_v8 = vld.sshfl [vmem:[#allocation1 + $0x8] sm:$0xff pattern:$0x75316420]  ;;  %v47_v4 = vlaneseq }
  0x13   :  { %43 = vrot.lane.b32.xlu1 %v30_v6, %s1425_s21  ;;  %173 = vst [vmem:[#allocation1] ss:$2 sm:$0xff] %v1469_v1  ;;  %v1481_v9 = vld.sshfl [vmem:[#allocation1 + $0x10] sm:$0xff pattern:$0x75316420] }
  0x14   :  { %v1483_v10 = vld.sshfl [vmem:[#allocation1 + $0x18] sm:$0xff pattern:$0x75316420] }
  0x15   :  { %177 = vst [vmem:[#allocation1 + $0x10] ss:$2 sm:$0xff] %v1464_v0 }
  0x1a   :  { %v174_v12 = vld.sshfl [vmem:[#allocation1] sm:$0xff pattern:$0x75316420]  ;;  %v175_v13 = vld.sshfl [vmem:[#allocation1 + $0x8] sm:$0xff pattern:$0x75316420] }
  0x1b   :  { %184 = vrot.lane.b32.xlu0 %v174_v12, %s1426_s23  ;;  %188 = vrot.lane.b32.xlu1 %v175_v13, %s1426_s23  ;;  %200 = vst [vmem:[#allocation1] ss:$2 sm:$0xff] %v1307_v11 }
  0x1c   :  { %v178_v14 = vld.sshfl [vmem:[#allocation1 + $0x10] sm:$0xff pattern:$0x75316420]  ;;  %v179_v15 = vld.sshfl [vmem:[#allocation1 + $0x18] sm:$0xff pattern:$0x75316420] }
  0x1d   :  { %204 = vst [vmem:[#allocation1 + $0x10] ss:$2 sm:$0xff] %v1307_v11  ;;  %186 = vrot.lane.b32.xlu2 %v178_v14, %s1426_s23  ;;  %v1574_v14 = vand.u32 127, %v47_v4 }
  0x1f   :  { %vm49_vm0 = vcmp.lt.s32.totalorder %v1574_v14, 17  ;;  %vm192_vm1 = vcmp.lt.s32.totalorder %v1574_v14, 16  ;;  %vm335_vm4 = vcmp.lt.s32.totalorder %v1574_v14, 15  ;;  %vm478_vm5 = vcmp.lt.s32.totalorder %v1574_v14, 1 }
  0x20   :  { %vm724_vm6 = vcmp.lt.s32.totalorder %v1574_v14, 127  ;;  %vm867_vm7 = vcmp.lt.s32.totalorder %v1574_v14, 113  ;;  %vm1010_vm8 = vcmp.lt.s32.totalorder %v1574_v14, 112  ;;  %vm1153_vm9 = vcmp.lt.s32.totalorder %v1574_v14, 111 }
  0x22   :  { %v1492_v16 = vld.sshfl [vmem:[#allocation1] sm:$0xff pattern:$0x75316420]  ;;  %v1494_v17 = vld.sshfl [vmem:[#allocation1 + $0x8] sm:$0xff pattern:$0x75316420] }
  0x23   :  { %316 = vst [vmem:[#allocation1] ss:$2 sm:$0xff] %v1469_v1 }
  0x24   :  { %v1497_v18 = vld.sshfl [vmem:[#allocation1 + $0x10] sm:$0xff pattern:$0x75316420]  ;;  %v1499_v19 = vld.sshfl [vmem:[#allocation1 + $0x18] sm:$0xff pattern:$0x75316420] }
  0x25   :  { %320 = vst [vmem:[#allocation1 + $0x10] ss:$2 sm:$0xff] %v1464_v0  ;;  %190 = vrot.lane.b32.xlu2 %v179_v15, %s1426_s23 }
  0x2a   :  { %v317_v21 = vld.sshfl [vmem:[#allocation1] sm:$0xff pattern:$0x75316420]  ;;  %v318_v22 = vld.sshfl [vmem:[#allocation1 + $0x8] sm:$0xff pattern:$0x75316420] }
  0x2b   :  { %327 = vrot.lane.b32.xlu1 %v317_v21, %s1427_s26  ;;  %343 = vst [vmem:[#allocation1] ss:$2 sm:$0xff] %v1317_v20 }
  0x2c   :  { %v321_v23 = vld.sshfl [vmem:[#allocation1 + $0x10] sm:$0xff pattern:$0x75316420]  ;;  %v322_v24 = vld.sshfl [vmem:[#allocation1 + $0x18] sm:$0xff pattern:$0x75316420] }
  0x2d   :  { %347 = vst [vmem:[#allocation1 + $0x10] ss:$2 sm:$0xff] %v1317_v20  ;;  %333 = vrot.lane.b32.xlu0 %v322_v24, %s1427_s26  ;;  %329 = vrot.lane.b32.xlu2 %v321_v23, %s1427_s26 }
  0x32   :  { %v1506_v25 = vld.sshfl [vmem:[#allocation1] sm:$0xff pattern:$0x75316420]  ;;  %v1508_v26 = vld.sshfl [vmem:[#allocation1 + $0x8] sm:$0xff pattern:$0x75316420] }
  0x33   :  { %459 = vst [vmem:[#allocation1] ss:$2 sm:$0xff] %v1469_v1 }
  0x34   :  { %v1511_v27 = vld.sshfl [vmem:[#allocation1 + $0x10] sm:$0xff pattern:$0x75316420]  ;;  %v1513_v28 = vld.sshfl [vmem:[#allocation1 + $0x18] sm:$0xff pattern:$0x75316420] }
  0x35   :  { %463 = vst [vmem:[#allocation1 + $0x10] ss:$2 sm:$0xff] %v1464_v0  ;;  %331 = vrot.lane.b32.xlu2 %v318_v22, %s1427_s26 }
  0x3a   :  { %v461_v30 = vld.sshfl [vmem:[#allocation1 + $0x8] sm:$0xff pattern:$0x75316420]  ;;  %v460_v31 = vld.sshfl [vmem:[#allocation1] sm:$0xff pattern:$0x75316420] }
  0x3b   :  { %486 = vst [vmem:[#allocation1] ss:$2 sm:$0xff] %v1327_v29 }
  0x3c   :  { %v464_v32 = vld.sshfl [vmem:[#allocation1 + $0x10] sm:$0xff pattern:$0x75316420]  ;;  %v465_v33 = vld.sshfl [vmem:[#allocation1 + $0x18] sm:$0xff pattern:$0x75316420] }
  0x3d   :  { %472 = vrot.lane.b32.xlu0 %v464_v32, %s1428_s29  ;;  %490 = vst [vmem:[#allocation1 + $0x10] ss:$2 sm:$0xff] %v1327_v29  ;;  %476 = vrot.lane.b32.xlu1 %v465_v33, %s1428_s29 }
  0x3e   :  { %470 = vrot.lane.b32.xlu2 %v460_v31, %s1428_s29 }
  0x42   :  { %v1519_v34 = vld.sshfl [vmem:[#allocation1] sm:$0xff pattern:$0x75316420]  ;;  %v1521_v35 = vld.sshfl [vmem:[#allocation1 + $0x8] sm:$0xff pattern:$0x75316420] }
  0x43   :  { %604 = vst [vmem:[#allocation1] ss:$2 sm:$0xff] %v1469_v1 }
  0x44   :  { %v1524_v36 = vld.sshfl [vmem:[#allocation1 + $0x10] sm:$0xff pattern:$0x75316420]  ;;  %v1526_v37 = vld.sshfl [vmem:[#allocation1 + $0x18] sm:$0xff pattern:$0x75316420] }
  0x45   :  { %709 = vst [vmem:[#allocation1 + $0x10] ss:$2 sm:$0xff] %v1464_v0  ;;  %474 = vrot.lane.b32.xlu0 %v461_v30, %s1428_s29 }
  0x4a   :  { %v1532_v39 = vld.sshfl [vmem:[#allocation1] sm:$0xff pattern:$0x75316420]  ;;  %v1534_v40 = vld.sshfl [vmem:[#allocation1 + $0x8] sm:$0xff pattern:$0x75316420] }
  0x4b   :  { %654 = vst [vmem:[#allocation1] ss:$2 sm:$0xff] %v1464_v0 }
  0x4c   :  { %v710_v41 = vld.sshfl [vmem:[#allocation1 + $0x10] sm:$0xff pattern:$0x75316420]  ;;  %v711_v42 = vld.sshfl [vmem:[#allocation1 + $0x18] sm:$0xff pattern:$0x75316420] }
  0x4d   :  { %736 = vst [vmem:[#allocation1 + $0x10] ss:$2 sm:$0xff] %v1346_v38  ;;  %718 = vrot.lane.b32.xlu1 %v710_v41, %s1429_s6  ;;  %722 = vrot.lane.b32.xlu2 %v711_v42, %s1429_s6  ;;  %v71_v41 = vld [vmem:[%s1782_s1] sm:$0xff] }
  0x52   :  { %v1537_v43 = vld.sshfl [vmem:[#allocation1] sm:$0xff pattern:$0x75316420]  ;;  %v1539_v44 = vld.sshfl [vmem:[#allocation1 + $0x8] sm:$0xff pattern:$0x75316420] }
  0x53   :  { %705 = vst [vmem:[#allocation1] ss:$2 sm:$0xff] %v1469_v1 }
  0x54   :  { %v1542_v45 = vld.sshfl [vmem:[#allocation1 + $0x10] sm:$0xff pattern:$0x75316420]  ;;  %v1544_v46 = vld.sshfl [vmem:[#allocation1 + $0x18] sm:$0xff pattern:$0x75316420] }
  0x55   :  { %852 = vst [vmem:[#allocation1 + $0x10] ss:$2 sm:$0xff] %v1464_v0 }
  0x5a   :  { %v706_v48 = vld.sshfl [vmem:[#allocation1] sm:$0xff pattern:$0x75316420]  ;;  %v707_v49 = vld.sshfl [vmem:[#allocation1 + $0x8] sm:$0xff pattern:$0x75316420] }
  0x5b   :  { %716 = vrot.lane.b32.xlu0 %v706_v48, %s1429_s6  ;;  %720 = vrot.lane.b32.xlu1 %v707_v49, %s1429_s6  ;;  %732 = vst [vmem:[#allocation1] ss:$2 sm:$0xff] %v1346_v38 }
  0x5c   :  { %v853_v50 = vld.sshfl [vmem:[#allocation1 + $0x10] sm:$0xff pattern:$0x75316420]  ;;  %v854_v51 = vld.sshfl [vmem:[#allocation1 + $0x18] sm:$0xff pattern:$0x75316420] }
  0x5d   :  { %879 = vst [vmem:[#allocation1 + $0x10] ss:$2 sm:$0xff] %v1356_v47  ;;  %861 = vrot.lane.b32.xlu2 %v853_v50, %s1430_s9  ;;  %v1308_v50 = vld [vmem:[%s1782_s1 + $0x8] sm:$0xff] }
  0x62   :  { %v1550_v52 = vld.sshfl [vmem:[#allocation1] sm:$0xff pattern:$0x75316420]  ;;  %v1552_v53 = vld.sshfl [vmem:[#allocation1 + $0x8] sm:$0xff pattern:$0x75316420] }
  0x63   :  { %848 = vst [vmem:[#allocation1] ss:$2 sm:$0xff] %v1469_v1  ;;  %865 = vrot.lane.b32.xlu0 %v854_v51, %s1430_s9 }
  0x64   :  { %v1555_v54 = vld.sshfl [vmem:[#allocation1 + $0x10] sm:$0xff pattern:$0x75316420]  ;;  %v1557_v55 = vld.sshfl [vmem:[#allocation1 + $0x18] sm:$0xff pattern:$0x75316420] }
  0x65   :  { %995 = vst [vmem:[#allocation1 + $0x10] ss:$2 sm:$0xff] %v1464_v0 }
  0x6a   :  { %v849_v57 = vld.sshfl [vmem:[#allocation1] sm:$0xff pattern:$0x75316420]  ;;  %v850_v58 = vld.sshfl [vmem:[#allocation1 + $0x8] sm:$0xff pattern:$0x75316420] }
  0x6b   :  { %859 = vrot.lane.b32.xlu1 %v849_v57, %s1430_s9  ;;  %875 = vst [vmem:[#allocation1] ss:$2 sm:$0xff] %v1356_v47  ;;  %863 = vrot.lane.b32.xlu2 %v850_v58, %s1430_s9  ;;  %s1287_s9 = sshll.u32 %s1785_s4, 4  ;;  %s1288_s9 = int_to_ptr.hbm [resolvable:$true] %s1287_s9 }
  0x6c   :  { %v996_v59 = vld.sshfl [vmem:[#allocation1 + $0x10] sm:$0xff pattern:$0x75316420]  ;;  %v997_v60 = vld.sshfl [vmem:[#allocation1 + $0x18] sm:$0xff pattern:$0x75316420] }
  0x6d   :  { %1004 = vrot.lane.b32.xlu0 %v996_v59, %s1431_s12  ;;  %1022 = vst [vmem:[#allocation1 + $0x10] ss:$2 sm:$0xff] %v1366_v56 }
  0x72   :  { %v1563_v61 = vld.sshfl [vmem:[#allocation1] sm:$0xff pattern:$0x75316420]  ;;  %v1565_v62 = vld.sshfl [vmem:[#allocation1 + $0x8] sm:$0xff pattern:$0x75316420] }
  0x73   :  { %991 = vst [vmem:[#allocation1] ss:$2 sm:$0xff] %v1469_v1  ;;  %1008 = vrot.lane.b32.xlu1 %v997_v60, %s1431_s12 }
  0x74   :  { %v1568_v63 = vld.sshfl [vmem:[#allocation1 + $0x10] sm:$0xff pattern:$0x75316420]  ;;  %v1570_v2 = vld.sshfl [vmem:[#allocation1 + $0x18] sm:$0xff pattern:$0x75316420] }
  0x75   :  { %1138 = vst [vmem:[#allocation1 + $0x10] ss:$2 sm:$0xff] %v1464_v0 }
  0x77   :  { %v187_v3 = vpop.permute.xlu2 %186 }
  0x7a   :  { %v993_v5 = vld.sshfl [vmem:[#allocation1 + $0x8] sm:$0xff pattern:$0x75316420]  ;;  %v992_v6 = vld.sshfl [vmem:[#allocation1] sm:$0xff pattern:$0x75316420] }
  0x7b   :  { %1006 = vrot.lane.b32.xlu0 %v993_v5, %s1431_s12  ;;  %1002 = vrot.lane.b32.xlu2 %v992_v6, %s1431_s12  ;;  %1018 = vst [vmem:[#allocation1] ss:$2 sm:$0xff] %v1366_v56  ;;  %s1435_s12 = smov 256  }
  0x7c   :  { %v1139_v11 = vld.sshfl [vmem:[#allocation1 + $0x10] sm:$0xff pattern:$0x75316420]  ;;  %v42_v12 = vpop.permute.xlu0 %41  ;;  %v1140_v15 = vld.sshfl [vmem:[#allocation1 + $0x18] sm:$0xff pattern:$0x75316420] }
  0x7d   :  { %1147 = vrot.lane.b32.xlu1 %v1139_v11, %s1432_s13  ;;  %v40_v13 = vpop.permute.xlu1 %39 }
  0x7f   :  { %v191_v21 = vpop.permute.xlu2 %190 }
  0x80   :  { %v194_v30 = vsel %vm192_vm1, %v187_v3, %v191_v21  ;;  %v196_v31 = vsel %vm192_vm1, %v191_v21, %v187_v3 }
  0x82   :  { %v1578_v0 = vld.sshfl [vmem:[#allocation1] sm:$0xff pattern:$0x75316420]  ;;  %v1580_v20 = vld.sshfl [vmem:[#allocation1 + $0x8] sm:$0xff pattern:$0x75316420] }
  0x83   :  { %1134 = vst [vmem:[#allocation1] ss:$2 sm:$0xff] %v1469_v1  ;;  %1151 = vrot.lane.b32.xlu2 %v1140_v15, %s1432_s13 }
  0x84   :  { %v46_v22 = vpop.permute.xlu0 %45 }
  0x85   :  { %v51_v23 = vsel %vm49_vm0, %v42_v12, %v46_v22  ;;  %v53_v24 = vsel %vm49_vm0, %v46_v22, %v42_v12  ;;  %v44_v29 = vpop.permute.xlu1 %43  ;;  %v1328_v22 = vld [vmem:[%s1782_s1 + $0x18] sm:$0xff] }
  0x86   :  { %v50_v1 = vsel %vm49_vm0, %v40_v13, %v44_v29  ;;  %v52_v32 = vsel %vm49_vm0, %v44_v29, %v40_v13  ;;  %v69_v33 = vmul.f32 %v1481_v9, %v53_v24  ;;  %v70_v38 = vmul.f32 %v1483_v10, %v51_v23  ;;  %v1318_v13 = vld [vmem:[%s1782_s1 + $0x10] sm:$0xff] }
  0x87   :  { %v67_v42 = vmul.f32 %v1476_v7, %v52_v32  ;;  %v68_v47 = vmul.f32 %v1478_v8, %v50_v1  ;;  %v213_v9 = vmul.f32 %v1497_v18, %v196_v31  ;;  %v214_v10 = vmul.f32 %v1499_v19, %v194_v30  ;;  %v330_v57 = vpop.permute.xlu2 %329  ;;  %v1337_v31 = vld [vmem:[%s1782_s1 + $0x20] sm:$0xff] }
  0x88   :  { %1303 = vmatpush.msk.msra.mxu2 %vm76_vm2, %v69_v33  ;;  %1305 = vmatpush.msk.msra.mxu3 %vm76_vm2, %v70_v38  ;;  %v1347_v33 = vld [vmem:[%s1782_s1 + $0x28] sm:$0xff] }
  0x89   :  { %1304 = vmatmul.msk.f32.vlgmr.msra.gmra.mxu2 %vm72_vm3, %v71_v41  ;;  %1306 = vmatmul.msk.f32.vlgmr.msra.gmra.mxu3 %vm72_vm3, %v71_v41 }
  0x8a   :  { %v1136_v48 = vld.sshfl [vmem:[#allocation1 + $0x8] sm:$0xff pattern:$0x75316420]  ;;  %v1135_v49 = vld.sshfl [vmem:[#allocation1] sm:$0xff pattern:$0x75316420]  ;;  %1299 = vmatpush.msk.msra.mxu0 %vm76_vm2, %v67_v42  ;;  %1301 = vmatpush.msk.msra.mxu1 %vm76_vm2, %v68_v47 }
  0x8b   :  { %1149 = vrot.lane.b32.xlu1 %v1136_v48, %s1432_s13  ;;  %1145 = vrot.lane.b32.xlu0 %v1135_v49, %s1432_s13 }
  0x8c   :  { %1300 = vmatmul.msk.f32.vlgmr.msra.gmra.mxu0 %vm72_vm3, %v71_v41  ;;  %1302 = vmatmul.msk.f32.vlgmr.msra.gmra.mxu1 %vm72_vm3, %v71_v41 }
  0x8d   :  { %v185_v7 = vpop.permute.xlu0 %184  ;;  %v189_v8 = vpop.permute.xlu1 %188  ;;  %1313 = vmatpush.msk.msrb.mxu2 %vm76_vm2, %v213_v9  ;;  %1315 = vmatpush.msk.msrb.mxu3 %vm76_vm2, %v214_v10 }
  0x8e   :  { %v193_v18 = vsel %vm192_vm1, %v185_v7, %v189_v8  ;;  %v195_v19 = vsel %vm192_vm1, %v189_v8, %v185_v7 }
  0x8f   :  { %v211_v51 = vmul.f32 %v1492_v16, %v195_v19  ;;  %v212_v56 = vmul.f32 %v1494_v17, %v193_v18  ;;  %v332_v59 = vpop.permute.xlu2 %331 }
  0x91   :  { %1314 = vmatmul.msk.f32.vlgmr.msrb.gmra.mxu2 %vm72_vm3, %v1308_v50  ;;  %1316 = vmatmul.msk.f32.vlgmr.msrb.gmra.mxu3 %vm72_vm3, %v1308_v50 }
  0x92   :  { %1309 = vmatpush.msk.msrb.mxu0 %vm76_vm2, %v211_v51  ;;  %1311 = vmatpush.msk.msrb.mxu1 %vm76_vm2, %v212_v56 }
  0x94   :  { %1310 = vmatmul.msk.f32.vlgmr.msrb.gmra.mxu0 %vm72_vm3, %v1308_v50  ;;  %1312 = vmatmul.msk.f32.vlgmr.msrb.gmra.mxu1 %vm72_vm3, %v1308_v50 }
  0x98   :  { %v471_v23 = vpop.permute.xlu2 %470 }
  0x9d   :  { %v328_v58 = vpop.permute.xlu1 %327 }
  0x9e   :  { %v336_v16 = vsel %vm335_vm4, %v328_v58, %v332_v59  ;;  %v338_v60 = vsel %vm335_vm4, %v332_v59, %v328_v58 }
  0x9f   :  { %v334_v17 = vpop.permute.xlu0 %333  ;;  %v354_v3 = vmul.f32 %v1506_v25, %v338_v60  ;;  %v355_v4 = vmul.f32 %v1508_v26, %v336_v16  ;;  %v1367_v60 = vld [vmem:[%s1782_s1 + $0x38] sm:$0xff] }
  0xa0   :  { %v337_v5 = vsel %vm335_vm4, %v330_v57, %v334_v17  ;;  %v339_v6 = vsel %vm335_vm4, %v334_v17, %v330_v57 }
  0xa1   :  { %v356_v11 = vmul.f32 %v1511_v27, %v339_v6  ;;  %v357_v12 = vmul.f32 %v1513_v28, %v337_v5  ;;  %1319 = vmatpush.msk.msra.mxu0 %vm76_vm2, %v354_v3  ;;  %1321 = vmatpush.msk.msra.mxu1 %vm76_vm2, %v355_v4 }
  0xa2   :  { %1320 = vmatmul.msk.f32.vlgmr.msra.gmra.mxu0 %vm72_vm3, %v1318_v13  ;;  %1322 = vmatmul.msk.f32.vlgmr.msra.gmra.mxu1 %vm72_vm3, %v1318_v13 }
  0xa3   :  { %1323 = vmatpush.msk.msra.mxu2 %vm76_vm2, %v356_v11  ;;  %1325 = vmatpush.msk.msra.mxu3 %vm76_vm2, %v357_v12 }
  0xa4   :  { %1324 = vmatmul.msk.f32.vlgmr.msra.gmra.mxu2 %vm72_vm3, %v1318_v13  ;;  %1326 = vmatmul.msk.f32.vlgmr.msra.gmra.mxu3 %vm72_vm3, %v1318_v13 }
  0xaf   :  { %v473_v25 = vpop.permute.xlu0 %472  ;;  %v477_v26 = vpop.permute.xlu1 %476 }
  0xb0   :  { %v480_v27 = vsel %vm478_vm5, %v473_v25, %v477_v26  ;;  %v482_v28 = vsel %vm478_vm5, %v477_v26, %v473_v25 }
  0xb1   :  { %v499_v15 = vmul.f32 %v1524_v36, %v482_v28  ;;  %v500_v21 = vmul.f32 %v1526_v37, %v480_v27  ;;  %v1377_v28 = vld [vmem:[%s1782_s1 + $0x40] sm:$0xff] }
  0xb3   :  { %1333 = vmatpush.msk.msrb.mxu2 %vm76_vm2, %v499_v15  ;;  %1335 = vmatpush.msk.msrb.mxu3 %vm76_vm2, %v500_v21 }
  0xb4   :  { %1334 = vmatmul.msk.f32.vlgmr.msrb.gmra.mxu2 %vm72_vm3, %v1328_v22  ;;  %1336 = vmatmul.msk.f32.vlgmr.msrb.gmra.mxu3 %vm72_vm3, %v1328_v22 }
  0xb5   :  { %1342 = vmatpush.msk.msra.mxu2 %vm76_vm2, %v1537_v43  ;;  %1344 = vmatpush.msk.msra.mxu3 %vm76_vm2, %v1539_v44 }
  0xb7   :  { %v475_v36 = vpop.permute.xlu0 %474 }
  0xb8   :  { %v479_v37 = vsel %vm478_vm5, %v471_v23, %v475_v36  ;;  %v481_v24 = vsel %vm478_vm5, %v475_v36, %v471_v23 }
  0xb9   :  { %v497_v29 = vmul.f32 %v1519_v34, %v481_v24  ;;  %v498_v30 = vmul.f32 %v1521_v35, %v479_v37  ;;  %v723_v34 = vpop.permute.xlu2 %722 }
  0xbb   :  { %1329 = vmatpush.msk.msrb.mxu0 %vm76_vm2, %v497_v29  ;;  %1331 = vmatpush.msk.msrb.mxu1 %vm76_vm2, %v498_v30 }
  0xbc   :  { %1330 = vmatmul.msk.f32.vlgmr.msrb.gmra.mxu0 %vm72_vm3, %v1328_v22  ;;  %1332 = vmatmul.msk.f32.vlgmr.msrb.gmra.mxu1 %vm72_vm3, %v1328_v22 }
  0xbd   :  { %1343 = vmatmul.msk.f32.vlgmr.msra.gmra.mxu2 %vm72_vm3, %v1337_v31  ;;  %1345 = vmatmul.msk.f32.vlgmr.msra.gmra.mxu3 %vm72_vm3, %v1337_v31 }
  0xbe   :  { %1338 = vmatpush.msk.msra.mxu0 %vm76_vm2, %v1532_v39  ;;  %1340 = vmatpush.msk.msra.mxu1 %vm76_vm2, %v1534_v40  ;;  %v1433_v39 = vmov 0   ;;  %v20_v40 = vld [vmem:[%s1783_s2] sm:$0xff] }
  0xbf   :  { %v719_v35 = vpop.permute.xlu1 %718  ;;  %1397 = vset.pattern.permute.xlu2 %v1433_v39  ;;  %1398 = vset.pattern.permute.xlu0 %v1433_v39 }
  0xc0   :  { %v726_v43 = vsel %vm724_vm6, %v719_v35, %v723_v34  ;;  %v728_v44 = vsel %vm724_vm6, %v723_v34, %v719_v35  ;;  %23 = vperm.xlu2 %1397, %v20_v40  }
  0xc1   :  { %v745_v1 = vmul.f32 %v1542_v45, %v726_v43  ;;  %v746_v32 = vmul.f32 %v1544_v46, %v728_v44  ;;  %v1376_v45 = vld [vmem:[%s1784_s3 + $0x40] sm:$0xff]  ;;  %v862_v10 = vpop.permute.xlu2 %861 }
  0xc2   :  { %1165 = vst [vmem:[#allocation1 + $0x10] ss:$2 sm:$0xff] %v1376_v45 }
  0xc3   :  { %1352 = vmatpush.msk.msrb.mxu2 %vm76_vm2, %v745_v1  ;;  %1354 = vmatpush.msk.msrb.mxu3 %vm76_vm2, %v746_v32  ;;  %1161 = vst [vmem:[#allocation1] ss:$2 sm:$0xff] %v1376_v45 }
  0xc4   :  { %1339 = vmatmul.msk.f32.vlgmr.msra.gmra.mxu0 %vm72_vm3, %v1337_v31  ;;  %1341 = vmatmul.msk.f32.vlgmr.msra.gmra.mxu1 %vm72_vm3, %v1337_v31 }
  0xc5   :  { %1355 = vmatmul.msk.f32.vlgmr.msrb.gmra.mxu3 %vm72_vm3, %v1347_v33  ;;  %1353 = vmatmul.msk.f32.vlgmr.msrb.gmra.mxu2 %vm72_vm3, %v1347_v33 }
  0xc9   :  { %v864_v18 = vpop.permute.xlu2 %863  ;;  %v1166_v4 = vld.sshfl [vmem:[#allocation1 + $0x10] sm:$0xff pattern:$0x75316420]  ;;  %v1167_v5 = vld.sshfl [vmem:[#allocation1 + $0x18] sm:$0xff pattern:$0x75316420] }
  0xcd   :  { %v717_v46 = vpop.permute.xlu0 %716  ;;  %v721_v38 = vpop.permute.xlu1 %720 }
  0xce   :  { %v725_v41 = vsel %vm724_vm6, %v717_v46, %v721_v38  ;;  %v727_v42 = vsel %vm724_vm6, %v721_v38, %v717_v46 }
  0xcf   :  { %v743_v47 = vmul.f32 %v1550_v52, %v725_v41  ;;  %v744_v9 = vmul.f32 %v1552_v53, %v727_v42  ;;  %v1357_v53 = vld [vmem:[%s1782_s1 + $0x30] sm:$0xff] }
  0xd1   :  { %1348 = vmatpush.msk.msrb.mxu0 %vm76_vm2, %v743_v47  ;;  %1350 = vmatpush.msk.msrb.mxu1 %vm76_vm2, %v744_v9 }
  0xd2   :  { %1349 = vmatmul.msk.f32.vlgmr.msrb.gmra.mxu0 %vm72_vm3, %v1347_v33  ;;  %1351 = vmatmul.msk.f32.vlgmr.msrb.gmra.mxu1 %vm72_vm3, %v1347_v33 }
  0xd5   :  { %v866_v48 = vpop.permute.xlu0 %865  ;;  %v1003_v57 = vpop.permute.xlu2 %1002 }
  0xd6   :  { %v869_v49 = vsel %vm867_vm7, %v862_v10, %v866_v48  ;;  %v871_v7 = vsel %vm867_vm7, %v866_v48, %v862_v10 }
  0xd7   :  { %v888_v8 = vmul.f32 %v1555_v54, %v869_v49  ;;  %v889_v52 = vmul.f32 %v1557_v55, %v871_v7 }
  0xd9   :  { %1362 = vmatpush.msk.msra.mxu2 %vm76_vm2, %v888_v8  ;;  %1364 = vmatpush.msk.msra.mxu3 %vm76_vm2, %v889_v52 }
  0xda   :  { %1363 = vmatmul.msk.f32.vlgmr.msra.gmra.mxu2 %vm72_vm3, %v1357_v53  ;;  %1365 = vmatmul.msk.f32.vlgmr.msra.gmra.mxu3 %vm72_vm3, %v1357_v53 }
  0xdd   :  { %v860_v19 = vpop.permute.xlu1 %859  ;;  %v1152_v3 = vpop.permute.xlu2 %1151 }
  0xde   :  { %v868_v50 = vsel %vm867_vm7, %v860_v19, %v864_v18  ;;  %v870_v51 = vsel %vm867_vm7, %v864_v18, %v860_v19 }
  0xdf   :  { %v886_v54 = vmul.f32 %v1563_v61, %v868_v50  ;;  %v887_v55 = vmul.f32 %v1565_v62, %v870_v51  ;;  %v1005_v56 = vpop.permute.xlu0 %1004 }
  0xe1   :  { %1358 = vmatpush.msk.msra.mxu0 %vm76_vm2, %v886_v54  ;;  %1360 = vmatpush.msk.msra.mxu1 %vm76_vm2, %v887_v55 }
  0xe2   :  { %1359 = vmatmul.msk.f32.vlgmr.msra.gmra.mxu0 %vm72_vm3, %v1357_v53  ;;  %1361 = vmatmul.msk.f32.vlgmr.msra.gmra.mxu1 %vm72_vm3, %v1357_v53 }
  0xe5   :  { %v1009_v58 = vpop.permute.xlu1 %1008 }
  0xe6   :  { %v1012_v59 = vsel %vm1010_vm8, %v1005_v56, %v1009_v58  ;;  %v1014_v61 = vsel %vm1010_vm8, %v1009_v58, %v1005_v56 }
  0xe7   :  { %v1031_v62 = vmul.f32 %v1568_v63, %v1012_v59  ;;  %v1032_v16 = vmul.f32 %v1570_v2, %v1014_v61 }
  0xe9   :  { %1372 = vmatpush.msk.msrb.mxu2 %vm76_vm2, %v1031_v62  ;;  %1374 = vmatpush.msk.msrb.mxu3 %vm76_vm2, %v1032_v16 }
  0xea   :  { %1373 = vmatmul.msk.f32.vlgmr.msrb.gmra.mxu2 %vm72_vm3, %v1367_v60  ;;  %1375 = vmatmul.msk.f32.vlgmr.msrb.gmra.mxu3 %vm72_vm3, %v1367_v60 }
  0xed   :  { %v1007_v17 = vpop.permute.xlu0 %1006 }
  0xee   :  { %v1011_v63 = vsel %vm1010_vm8, %v1003_v57, %v1007_v17  ;;  %v1013_v2 = vsel %vm1010_vm8, %v1007_v17, %v1003_v57 }
  0xef   :  { %v1148_v6 = vpop.permute.xlu1 %1147  ;;  %v1029_v11 = vmul.f32 %v1578_v0, %v1011_v63  ;;  %v1030_v12 = vmul.f32 %v1580_v20, %v1013_v2  ;;  %v1162_v0 = vld.sshfl [vmem:[#allocation1] sm:$0xff pattern:$0x75316420]  ;;  %v1163_v20 = vld.sshfl [vmem:[#allocation1 + $0x8] sm:$0xff pattern:$0x75316420] }
  0xf0   :  { %v1155_v13 = vsel %vm1153_vm9, %v1148_v6, %v1152_v3  ;;  %v1157_v25 = vsel %vm1153_vm9, %v1152_v3, %v1148_v6 }
  0xf1   :  { %v1174_v26 = vmul.f32 %v1166_v4, %v1155_v13  ;;  %v1175_v27 = vmul.f32 %v1167_v5, %v1157_v25  ;;  %1368 = vmatpush.msk.msrb.mxu0 %vm76_vm2, %v1029_v11  ;;  %1370 = vmatpush.msk.msrb.mxu1 %vm76_vm2, %v1030_v12 }
  0xf2   :  { %1369 = vmatmul.msk.f32.vlgmr.msrb.gmra.mxu0 %vm72_vm3, %v1367_v60  ;;  %1371 = vmatmul.msk.f32.vlgmr.msrb.gmra.mxu1 %vm72_vm3, %v1367_v60 }
  0xf3   :  { %1382 = vmatpush.msk.msra.mxu2 %vm76_vm2, %v1174_v26  ;;  %1384 = vmatpush.msk.msra.mxu3 %vm76_vm2, %v1175_v27 }
  0xf4   :  { %1383 = vmatmul.msk.f32.vlgmr.msra.gmra.mxu2 %vm72_vm3, %v1377_v28  ;;  %1385 = vmatmul.msk.f32.vlgmr.msra.gmra.mxu3 %vm72_vm3, %v1377_v28 }
  0xfd   :  { %v1150_v15 = vpop.permute.xlu1 %1149  ;;  %v1146_v21 = vpop.permute.xlu0 %1145 }
  0xfe   :  { %v1154_v22 = vsel %vm1153_vm9, %v1146_v21, %v1150_v15  ;;  %v1156_v23 = vsel %vm1153_vm9, %v1150_v15, %v1146_v21 }
  0xff   :  { %v1172_v36 = vmul.f32 %v1162_v0, %v1154_v22  ;;  %v1173_v37 = vmul.f32 %v1163_v20, %v1156_v23 }
 0x101   :  { %1378 = vmatpush.msk.msra.mxu0 %vm76_vm2, %v1172_v36  ;;  %1380 = vmatpush.msk.msra.mxu1 %vm76_vm2, %v1173_v37 }
 0x102   :  { %1379 = vmatmul.msk.f32.vlgmr.msra.gmra.mxu0 %vm72_vm3, %v1377_v28  ;;  %1381 = vmatmul.msk.f32.vlgmr.msra.gmra.mxu1 %vm72_vm3, %v1377_v28 }
 0x109   :  { %v100_v30 = vpop.f32.mrf.mxu0  ;;  %v120_v31 = vpop.f32.mrf.mxu1 }
 0x10c   :  { %v146_v24 = vpop.f32.mrf.mxu2  ;;  %v166_v29 = vpop.f32.mrf.mxu3 }
 0x111   :  { %v243_v43 = vpop.f32.mrf.mxu0  ;;  %v263_v44 = vpop.f32.mrf.mxu1 }
 0x114   :  { %v289_v34 = vpop.f32.mrf.mxu2  ;;  %v309_v35 = vpop.f32.mrf.mxu3 }
 0x11a   :  { %v24_v42 = vpop.permute.xlu2 %23 }
 0x11b   :  { %v171_v49 = vadd.f32 %v146_v24, %v24_v42  ;;  %v172_v7 = vadd.f32 %v166_v29, %v24_v42  ;;  %v169_v55 = vadd.f32 %v100_v30, %v24_v42  ;;  %v170_v56 = vadd.f32 %v120_v31, %v24_v42 }
 0x11d   :  { %v314_v8 = vadd.f32 %v289_v34, %v171_v49  ;;  %v315_v52 = vadd.f32 %v309_v35, %v172_v7  ;;  %v312_v59 = vadd.f32 %v243_v43, %v169_v55  ;;  %v313_v61 = vadd.f32 %v263_v44, %v170_v56 }
 0x11f   :  { %v386_v32 = vpop.f32.mrf.mxu0  ;;  %v406_v33 = vpop.f32.mrf.mxu1 }
 0x120   :  { %v455_v2 = vadd.f32 %v386_v32, %v312_v59  ;;  %v456_v4 = vadd.f32 %v406_v33, %v313_v61 }
 0x127   :  { %v432_v14 = vpop.f32.mrf.mxu2  ;;  %v452_v1 = vpop.f32.mrf.mxu3 }
 0x128   :  { %v457_v19 = vadd.f32 %v432_v14, %v314_v8  ;;  %v458_v50 = vadd.f32 %v452_v1, %v315_v52 }
 0x137   :  { %v575_v39 = vpop.f32.mrf.mxu2  ;;  %v595_v40 = vpop.f32.mrf.mxu3 }
 0x138   :  { %v600_v57 = vadd.f32 %v575_v39, %v457_v19  ;;  %v601_v58 = vadd.f32 %v595_v40, %v458_v50 }
 0x139   :  { %v529_v45 = vpop.f32.mrf.mxu0  ;;  %v549_v46 = vpop.f32.mrf.mxu1 }
 0x13a   :  { %v598_v11 = vadd.f32 %v529_v45, %v455_v2  ;;  %v599_v12 = vadd.f32 %v549_v46, %v456_v4 }
 0x140   :  { %v678_v38 = vpop.f32.mrf.mxu2  ;;  %v698_v41 = vpop.f32.mrf.mxu3 }
 0x141   :  { %v631_v47 = vpop.f32.mrf.mxu0  ;;  %v651_v9 = vpop.f32.mrf.mxu1  ;;  %v703_v60 = vadd.f32 %v678_v38, %v600_v57  ;;  %v704_v17 = vadd.f32 %v698_v41, %v601_v58 }
 0x142   :  { %v701_v21 = vadd.f32 %v631_v47, %v598_v11  ;;  %v702_v22 = vadd.f32 %v651_v9, %v599_v12 }
 0x148   :  { %v821_v10 = vpop.f32.mrf.mxu2  ;;  %v841_v48 = vpop.f32.mrf.mxu3 }
 0x149   :  { %v846_v5 = vadd.f32 %v821_v10, %v703_v60  ;;  %v847_v6 = vadd.f32 %v841_v48, %v704_v17 }
 0x14f   :  { %v775_v51 = vpop.f32.mrf.mxu0  ;;  %v795_v54 = vpop.f32.mrf.mxu1 }
 0x150   :  { %v844_v37 = vadd.f32 %v775_v51, %v701_v21  ;;  %v845_v24 = vadd.f32 %v795_v54, %v702_v22 }
 0x15d   :  { %v964_v53 = vpop.f32.mrf.mxu2  ;;  %v984_v18 = vpop.f32.mrf.mxu3 }
 0x15e   :  { %v989_v13 = vadd.f32 %v964_v53, %v846_v5  ;;  %v990_v25 = vadd.f32 %v984_v18, %v847_v6 }
 0x15f   :  { %v918_v3 = vpop.f32.mrf.mxu0  ;;  %v938_v63 = vpop.f32.mrf.mxu1 }
 0x160   :  { %v987_v29 = vadd.f32 %v918_v3, %v844_v37  ;;  %v988_v30 = vadd.f32 %v938_v63, %v845_v24 }
 0x16d   :  { %v1107_v62 = vpop.f32.mrf.mxu2  ;;  %v1127_v16 = vpop.f32.mrf.mxu3 }
 0x16e   :  { %v1132_v26 = vadd.f32 %v1107_v62, %v989_v13  ;;  %v1133_v27 = vadd.f32 %v1127_v16, %v990_v25 }
 0x16f   :  { %v1061_v28 = vpop.f32.mrf.mxu0  ;;  %v1081_v0 = vpop.f32.mrf.mxu1 }
 0x170   :  { %v1130_v31 = vadd.f32 %v1061_v28, %v987_v29  ;;  %v1131_v34 = vadd.f32 %v1081_v0, %v988_v30 }
 0x177   :  { %v1250_v20 = vpop.f32.mrf.mxu2  ;;  %v1270_v15 = vpop.f32.mrf.mxu3 }
 0x178   :  { %v1275_v23 = vadd.f32 %v1250_v20, %v1132_v26  ;;  %v1276_v36 = vadd.f32 %v1270_v15, %v1133_v27 }
 0x17a   :  { %1279 = vst [vmem:[#allocation2 + $0x10] sm:$0xff] %v1275_v23 }
 0x17b   :  { %1280 = vst [vmem:[#allocation2 + $0x18] sm:$0xff] %v1276_v36 }
 0x17f   :  { %v1204_v35 = vpop.f32.mrf.mxu0  ;;  %v1224_v43 = vpop.f32.mrf.mxu1 }
 0x180   :  { %v1273_v44 = vadd.f32 %v1204_v35, %v1130_v31  ;;  %v1274_v14 = vadd.f32 %v1224_v43, %v1131_v34 }
 0x182   :  { %1277 = vst [vmem:[#allocation2] sm:$0xff] %v1273_v44 }
 0x183   :  { %1278 = vst [vmem:[#allocation2 + $0x8] sm:$0xff] %v1274_v14 }
 0x184   :  { %1293 = dma.vmem_to_hbm [thread:$0]  %s1286_s11, 512, %s1288_s9, [#allocation3], %s1435_s12, %s1435_s12, %s1426_s23  }
 0x185   :  { %1423 = dma.done.wait [#allocation3], 512  }
 0x186   :  { %1424 = vsyncadd [#allocation3], 4294966784 }
 0x187   :  { %1298 = vsyncpa [#allocation3], 1 }

</bundles_post_ra>
